<compile_context>
chip_gen: v5e
topology: v5e:2x2
jax: 0.10.0
libtpu: 0.0.40
codegen_flags: <defaults>
</compile_context>

<pallas_src>
import functools

import jax
import jax.numpy as jnp
from jax.experimental import pallas as pl
from jax.experimental.pallas import tpu as pltpu


@functools.lru_cache(maxsize=None)
def _vmem_capacity_bytes():
    """Physical VMEM per core; conservative (v7x-sized) fallback if unknown."""
    try:
        return int(pltpu.get_tpu_info().vmem_capacity_bytes)
    except Exception:
        return 64 * 1024 * 1024


def _pick_tm(M, K, N, itemsize, *, target, budget):
    """Pick the spatial (lane) tile size tm for the flattened spatial axis M.

    Constraints:
      * Mosaic (8,128) rule on the block's last dim: tm == M or tm % 128 == 0.
      * tm divides M -> no ragged tail, no padding, no masked stores.
      * double-buffered working set (in tile + out tile + weight) <= budget.
    """
    def tile_bytes(tm):
        # 2x for double buffering of the streamed blocks; the weight block is
        # also counted twice to stay conservative.
        return 2 * itemsize * (K * tm + N * tm + K * N)

    if M <= 128 or M % 128 != 0:
        # Small / oddly sized spatial extent: one tile per batch element.
        return M
    tm = min((max(target, 128) // 128) * 128, M)
    while tm > 128 and (M % tm != 0 or tile_bytes(tm) > budget):
        tm -= 128
    while M % tm != 0:  # M % 128 == 0, so this terminates at tm == 128
        tm -= 128
    return tm


def _conv1x1_kernel(w_ref, z_ref, o_ref):
    # w_ref: (N, K)     weight, constant index map -> resident in VMEM
    # z_ref: (1, K, tm) channels-first activation tile (lane dim = spatial)
    # o_ref: (1, N, tm) output tile, written directly in channels-first layout
    o_ref[0] = jnp.dot(
        w_ref[...], z_ref[0], preferred_element_type=jnp.float32
    ).astype(o_ref.dtype)


def conv1x1_nchw(z, weight, *, tm_target=4096):
    """Batched 1x1 conv as a per-batch (N,K)x(K,M) matmul on the MXU.

    z:      (B, K, M)  channels-first, spatial flattened into the lane dim
    weight: (N, K)
    returns (B, N, M)
    """
    B, K, M = z.shape
    N, K2 = weight.shape
    assert K == K2

    vmem_cap = _vmem_capacity_bytes()
    itemsize = jnp.dtype(z.dtype).itemsize
    tm = _pick_tm(M, K, N, itemsize,
                  target=tm_target, budget=(vmem_cap * 3) // 5)
    grid = (B, pl.cdiv(M, tm))  # tm divides M (or tm == M) by construction

    return pl.pallas_call(
        _conv1x1_kernel,
        out_shape=jax.ShapeDtypeStruct((B, N, M), z.dtype),
        grid=grid,
        in_specs=[
            # Weight: full block, constant index map (fetched once, no
            # re-DMA across grid steps).
            pl.BlockSpec((N, K), lambda b, m: (0, 0)),
            # Activations: stream large spatial tiles; the lane dim is
            # 128-aligned whenever M allows it, amortizing per-grid-step
            # overhead and keeping loads/stores unmasked.
            pl.BlockSpec((1, K, tm), lambda b, m: (b, 0, m)),
        ],
        out_specs=pl.BlockSpec((1, N, tm), lambda b, m: (b, 0, m)),
        compiler_params=pltpu.CompilerParams(
            # Every grid step is independent -> both axes parallel (megacore /
            # 2-TC v7x sharding).
            dimension_semantics=("parallel", "parallel"),
            vmem_limit_bytes=int(vmem_cap * 0.85),
        ),
    )(weight, z)


def downsample_forward(x, weight, enable_time=True, *, tm_target=4096):
    """Mirror of Downsample.forward with downsample_space=True,
    downsample_time=False, nonlin=False.

    x:      (b, c, H, W) image  or  (b, c, f, H, W) video, channels-first.
    weight: (dim, 4*dim)  squeezed nn.Conv2d(dim*4, dim, 1, bias=False) weight.
    """
    is_video = x.ndim == 5
    if is_video:
        b, c, f, H, W = x.shape
    else:
        b, c, H, W = x.shape
        f = 1
    assert H % 2 == 0 and W % 2 == 0
    h, w = H // 2, W // 2
    dim = weight.shape[0]
    assert weight.shape == (dim, 4 * c)

    # Space-to-depth 'b c ... (h p1) (w p2) -> b (c p1 p2) (... h w)'.
    # This is the single remaining XLA layout pass; the reshapes merging
    # (c,p1,p2) -> 4c and (f,h,w) -> spatial are contiguous, hence free.
    if is_video:
        # Frames fold into the matmul's spatial axis: no 'b c f h w' <->
        # '(b f) c h w' pack/unpack transposes are ever materialized.
        z = x.reshape(b, c, f, h, 2, w, 2).transpose(0, 1, 4, 6, 2, 3, 5)
        z = z.reshape(b, 4 * c, f * h * w)
    else:
        z = x.reshape(b, c, h, 2, w, 2).transpose(0, 1, 3, 5, 2, 4)
        z = z.reshape(b, 4 * c, h * w)

    y = conv1x1_nchw(z, weight, tm_target=tm_target)  # (b, dim, spatial)

    # down_time is None (downsample_time=False) -> return regardless of
    # enable_time, matching the PyTorch control flow.  Output reshapes are
    # contiguous -> free.
    if is_video:
        return y.reshape(b, dim, f, h, w)
    return y.reshape(b, dim, h, w)


if __name__ == "__main__":
    def _ref_image(x, weight):
        b, c, H, W = x.shape
        h, w = H // 2, W // 2
        z = x.reshape(b, c, h, 2, w, 2).transpose(0, 1, 3, 5, 2, 4)
        z = z.reshape(b, 4 * c, h, w)
        return jnp.einsum("oi,bihw->bohw", weight, z)

    def _ref_video(x, weight):
        b, c, f, H, W = x.shape
        frames = [_ref_image(x[:, :, i], weight) for i in range(f)]
        return jnp.stack(frames, axis=2)  # (b, dim, f, h, w)

    key = jax.random.PRNGKey(0)
    kx, kw, kx2, kw2, kx3 = jax.random.split(key, 5)

    # 1) Small image config matching the PyTorch module defaults.
    dim, b, H, W = 4, 2, 16, 16
    x = jax.random.normal(kx, (b, dim, H, W), dtype=jnp.float32)
    fan_in = 4 * dim
    weight = jax.random.uniform(
        kw, (dim, 4 * dim), dtype=jnp.float32,
        minval=-1.0 / float(fan_in) ** 0.5, maxval=1.0 / float(fan_in) ** 0.5)

    out = jax.block_until_ready(downsample_forward(x, weight))
    ref = _ref_image(x, weight)
    assert out.shape == (b, dim, H // 2, W // 2)
    assert jnp.allclose(out, ref, atol=1e-5, rtol=1e-5)

    # 2) Larger image to exercise the multi-tile (tm < spatial) path.
    dim2, b2, H2, W2 = 8, 1, 128, 128
    x2 = jax.random.normal(kx2, (b2, dim2, H2, W2), dtype=jnp.float32)
    weight2 = jax.random.uniform(
        kw2, (dim2, 4 * dim2), dtype=jnp.float32, minval=-0.25, maxval=0.25)
    out2 = jax.block_until_ready(
        downsample_forward(x2, weight2, tm_target=1024))
    ref2 = _ref_image(x2, weight2)
    assert out2.shape == (b2, dim2, H2 // 2, W2 // 2)
    assert jnp.allclose(out2, ref2, atol=1e-4, rtol=1e-4)

    # 3) Video input (5-D) exercising the frame-folded path.
    f = 3
    x3 = jax.random.normal(kx3, (b, dim, f, H, W), dtype=jnp.float32)
    out3 = jax.block_until_ready(downsample_forward(x3, weight, enable_time=True))
    ref3 = _ref_video(x3, weight)
    assert out3.shape == (b, dim, f, H // 2, W // 2)
    assert jnp.allclose(out3, ref3, atol=1e-5, rtol=1e-5)

    print("KERNEL_OK")
</pallas_src>

<mosaic_0001>
module attributes {stable_mosaic.version = 11 : i64} {
  func.func @_conv1x1_kernel(%arg0: i32, %arg1: i32, %arg2: memref<4x16xf32, #tpu.memory_space<vmem>>, %arg3: memref<1x16x64xf32, #tpu.memory_space<vmem>>, %arg4: memref<1x4x64xf32, #tpu.memory_space<vmem>>) attributes {dimension_semantics = [#tpu.dimension_semantics<parallel>, #tpu.dimension_semantics<parallel>], iteration_bounds = array<i64: 2, 1>, scalar_prefetch = 0 : i64, scratch_operands = 0 : i64, tpu.core_type = #tpu.core_type<tc>, window_params = [{pipeline_mode = #tpu.pipeline_mode<synchronous>, transform_indices = @transform_0, window_bounds = array<i64: 4, 16>}, {transform_indices = @transform_1, window_bounds = array<i64: 1, 16, 64>}, {transform_indices = @transform_2, window_bounds = array<i64: 1, 4, 64>}]} {
    %c0 = arith.constant 0 : index
    %c0_0 = arith.constant 0 : index
    %0 = vector.load %arg2[%c0, %c0_0] : memref<4x16xf32, #tpu.memory_space<vmem>>, vector<4x16xf32>
    %c0_1 = arith.constant 0 : index
    %c0_2 = arith.constant 0 : index
    %c0_3 = arith.constant 0 : index
    %1 = vector.load %arg3[%c0_1, %c0_2, %c0_3] : memref<1x16x64xf32, #tpu.memory_space<vmem>>, vector<1x16x64xf32>
    %2 = vector.shape_cast %1 : vector<1x16x64xf32> to vector<16x64xf32>
    %cst = arith.constant dense<0.000000e+00> : vector<4x64xf32>
    %3 = tpu.matmul %0, %2, %cst {dimension_numbers = #tpu.dot_dimension_numbers<[1], [0], [0], [1], [0, 0, 1, 1], [], []>} : vector<4x16xf32>, vector<16x64xf32>, vector<4x64xf32> -> vector<4x64xf32>
    %c0_4 = arith.constant 0 : index
    %c0_5 = arith.constant 0 : index
    %c0_6 = arith.constant 0 : index
    %4 = vector.load %arg4[%c0_4, %c0_5, %c0_6] : memref<1x4x64xf32, #tpu.memory_space<vmem>>, vector<1x4x64xf32>
    %5 = vector.shape_cast %4 : vector<1x4x64xf32> to vector<4x64xf32>
    %6 = vector.shape_cast %3 : vector<4x64xf32> to vector<1x4x64xf32>
    tpu.vector_store %arg4[%c0_4, %c0_5, %c0_6], %6 {strides = array<i32>} : memref<1x4x64xf32, #tpu.memory_space<vmem>>, vector<1x4x64xf32>,
    return
  }
  func.func @transform_0(%arg0: i32, %arg1: i32) -> (i32, i32) {
    %c0_i32 = arith.constant 0 : i32
    %c0_i32_0 = arith.constant 0 : i32
    %c0_i32_1 = arith.constant 0 : i32
    return %c0_i32, %c0_i32_0 : i32, i32
  }
  func.func @transform_1(%arg0: i32, %arg1: i32) -> (i32, i32, i32) {
    %c0_i32 = arith.constant 0 : i32
    %c0_i32_0 = arith.constant 0 : i32
    return %arg0, %c0_i32, %arg1 : i32, i32, i32
  }
  func.func @transform_2(%arg0: i32, %arg1: i32) -> (i32, i32, i32) {
    %c0_i32 = arith.constant 0 : i32
    %c0_i32_0 = arith.constant 0 : i32
    return %arg0, %c0_i32, %arg1 : i32, i32, i32
  }
}

</mosaic_0001>

<bundles_post_ra>
// kernel: tpu_custom_call.1
= control target key start
LH: loop header
LB: loop body
LE: loop exit
PB: predicated region body
PF: predicated region fallthrough
CT: control target
= control target key end

     0   :  { %7 = vsyncpa [#allocation3], 0  ;;  %s746_s0 = inlined_call_operand.hbm [shape: f32[4,16], index: 0, kind: input, shape index: {}]   ;;  %s747_s1 = inlined_call_operand.hbm [shape: f32[2,16,64], index: 1, kind: input, shape index: {}]   ;;  %s748_s2 = inlined_call_operand.hbm [shape: f32[2,4,64], index: 2, kind: output, shape index: {}]  }
   0x1   :  { %8 = vsyncpa [#allocation6], 0 }
   0x2   :  { %10 = vsyncpa [#allocation6 + $0x1], 0 }
   0x3   :  { %11 = vsyncpa [#allocation4], 0 }
   0x4   :  { %13 = vsyncpa [#allocation4 + $0x1], 0  ;;  %s594_s9 = smov 0   ;;  %s596_s10 = smov 0  }
   0x5   :  { %s598_s11 = smov 0   ;;  %s600_s12 = smov 0  }
   0x6   :  { %s602_s13 = smov 0   ;;  %s604_s14 = smov 0  }
   0x7 LB: > { %s335_s15 = sadd.s32 4294967295, %s574_s14   ;;  %s336_s16 = sadd.s32 4294967294, %s574_s14   ;;  %s574_s14 = sphi %s604_s14, %s19_s14   ;;  %s570_s13 = sphi %s602_s13, %s760_s13   ;;  %s566_s12 = sphi %s600_s12, %s759_s12   ;;  %s562_s11 = sphi %s598_s11, %s758_s11   ;;  %s558_s10 = sphi %s596_s10, %s757_s10   ;;  %s554_s9 = sphi %s594_s9, %s756_s9  }
   0x8   : > { %s61_s17 = sadd.s32 1, %s562_s11  ;;  %p68_p0 = scmp.ne.s32.totalorder %s562_s11, %s558_s10 }
   0x9   : > { %p69_p1 = scmp.eq.s32.totalorder %s574_s14, 0  ;;  %p74_p2 = scmp.ne.s32.totalorder %s558_s10, %s554_s9 }
   0xa   : > { %p632_p3 = scmp.eq.s32.totalorder %s335_s15, 0  ;;  %p100_p4 = scmp.eq.s32.totalorder %s335_s15, 1 }
   0xb   : > { %p636_p5 = por %p69_p1, %p68_p0  ;;  %p106_p6 = scmp.eq.s32.totalorder %s336_s16, 1 }
   0xc   : > { %p642_p7 = por %p632_p3, %p74_p2  ;;  %p646_p8 = por %p100_p4, %p68_p0 }
   0xd   : > { %p650_p9 = por %p106_p6, %p74_p2  ;;  %p337_p10 = scmp.ge.s32.totalorder %s574_s14, 1 }
   0xe   : > { %p113_p11 = scmp.lt.s32.totalorder %s574_s14, 3  ;;  %s125_s25 = sshll.u32 %s746_s0, 4  ;;  %s126_s25 = int_to_ptr.hbm [resolvable:$true] %s125_s25 }
   0xf   : > { %s576_s27 = smov [#allocation2]   ;;  %p339_p13 = scmp.ge.s32.totalorder %s574_s14, 2 }
  0x10   : > { %p659_p12 = pnand %p337_p10, %p113_p11  ;;  %s127_s28 = sshll.u32 %s576_s27, 4  ;;  %s128_s28 = int_to_ptr.vmem [resolvable:$true] %s127_s28 }
  0x11   : > { %p374_p1 = scmp.lt.s32.totalorder %s574_s14, 2  ;;  %s31_s30 = sadd.s32 1, %s570_s13 }
  0x12   : > { %p361_p0 = pneg %p659_p12  ;;  %p33_p6 = scmp.ge.s32.totalorder %s31_s30, 2 }
  0x13   : > { %p671_p4 = pnand %p374_p1, %p636_p5  ;;  %s138_s3 = sand.u32 1, %s562_s11  }
  0x14   : > { %p362_p2 = pnand %p361_p0, %p632_p3  ;;  %s762_s30 = smov (%p33_p6, %s31_s30), 0 }
  0x15   : > { %s340_s4 = sshll.u32 %s138_s3, 4  ;;  %s56_s5 = ssub.s32 %s570_s13, %s762_s30 }
  0x16   : > { %364 = dma.hbm_to_vmem [thread:$0]  (!%p362_p2), %s126_s25, 64, %s128_s28, [#allocation3]  }
  0x17   : > { %p59_p10 = scmp.eq.s32.totalorder %s56_s5, 0  ;;  %s352_s6 = sshll.u32 %s570_s13, 4 }
  0x18   : > { %s148_s15 = scalar_lea.hbm %s747_s1, %s352_s6  ;;  %s142_s16 = scalar_lea.vmem [#allocation5], %s340_s4 }
  0x19   : > { %s151_s19 = sshll.u32 %s142_s16, 4  ;;  %s149_s24 = sshll.u32 %s148_s15, 4  ;;  %s152_s19 = int_to_ptr.vmem [resolvable:$true] %s151_s19  ;;  %s150_s24 = int_to_ptr.hbm [resolvable:$true] %s149_s24 }
  0x1a   : > { %s688_s23 = scalar_select %p59_p10, %s562_s11, %s61_s17  }
  0x1b   : > { %s139_s25 = scalar_lea.sflag [#allocation6], %s138_s3  ;;  %s577_s27 = smov 128  }
  0x1c   : > { %s578_s28 = smov 8   ;;  %163 = sbr.rel (%p659_p12) target bundleno = 171 (0xab), region = 28 }
  0x1d   : > { %368 = dma.hbm_to_vmem [thread:$0]  (!%p671_p4), %s150_s24, 256, %s152_s19, %s139_s25, %s577_s27, %s577_s27, %s578_s28  }
  0x21   : > { %541 = dma.done.wait (%p632_p3), [#allocation3], 64  }
  0x22   : > { %543 = vsyncadd (%p632_p3), [#allocation3], 4294967232  ;;  %s699_s17 = sand.u32 1, %s558_s10  }
  0x23   : > { %s345_s3 = sshll.u32 %s699_s17, 4  ;;  %s171_s4 = scalar_lea.sflag [#allocation6], %s699_s17 }
  0x24   : > { %s174_s5 = scalar_lea.vmem [#allocation5], %s345_s3 }
  0x25   : > { %545 = dma.done.wait (%p642_p7), %s171_s4, 256  }
  0x26   : > { %547 = vsyncadd (%p642_p7), %s171_s4, 4294967040  ;;  %v198_v0 = vld [vmem:[%s174_s5 + $0x8] sm:$0xff]  ;;  %v197_v1 = vld [vmem:[%s174_s5] sm:$0xff]  ;;  %vm199_vm0 = vcmask 130048   ;;  %s346_s18 = sshll.u32 %s699_s17, 2  ;;  %s349_s26 = sshll.u32 %s566_s12, 2 }
  0x27   : > { %217 = vmatpush.msra.mxu0 %v198_v0  ;;  %v196_v2 = vld [vmem:[#allocation2] sm:$0xf]  ;;  %s237_s7 = scalar_lea.hbm %s748_s2, %s349_s26  ;;  %s195_s8 = scalar_lea.vmem [#allocation7], %s346_s18  ;;  %vm223_vm1 = vcmask 519168  }
  0x28   : > { %s239_s20 = sshll.u32 %s195_s8, 4  ;;  %s241_s15 = sshll.u32 %s237_s7, 4  ;;  %s240_s20 = int_to_ptr.vmem [resolvable:$true] %s239_s20  ;;  %s242_s15 = int_to_ptr.hbm [resolvable:$true] %s241_s15 }
  0x29   : > { %218 = vmatpush.msra.mxu0 %v197_v1  ;;  %s226_s16 = scalar_lea.sflag [#allocation4], %s699_s17  ;;  %s502_s19 = sshra.s32 %s242_s15, 4  ;;  %s503_s19 = int_to_ptr.hbm [resolvable:$true] %s502_s19 }
  0x2a   : > { %347 = vmatmul.msk.f32.vlgmr.msra.gmra.mxu0 %vm199_vm0, %v196_v2  ;;  %s504_s24 = scalar_lea.hbm %s503_s19, 4  ;;  %s508_s27 = scalar_lea.hbm %s748_s2, 8 }
  0x2b   : > { %p505_p3 = scmp.ne.s32.totalorder %s503_s19, %s504_s24  ;;  %p509_p11 = scmp.lt.s32.totalorder %s503_s19, %s748_s2 }
  0x2c   : > { %p510_p12 = scmp.lt.s32.totalorder %s508_s27, %s504_s24 }
  0x2d   : > { %p506_p5 = pnand %p505_p3, %p646_p8 }
  0x2e   : > { %p511_p0 = por %p510_p12, %p509_p11 }
  0x2f   : > { %p507_p7 = pneg %p506_p5 }
  0x31   : > { %p512_p1 = pnand %p511_p0, %p507_p7 }
  0xa7   : > { %v220_v3 = vpop.f32.mrf.mxu0 }
  0xa8   : > { %224 = vst.msk [vmem:[%s195_s8] sm:$0xf] %vm223_vm1, %v220_v3 }
  0xa9   : > { %515 = shalt.err (!%p512_p1)
}
  0xaa   : > { %359 = dma.vmem_to_hbm [thread:$0]  (%p646_p8), %s240_s20, 64, %s242_s15, %s226_s16  }
  0xab PF: > { %s253_s17 = sand.u32 1, %s554_s9   ;;  %p370_p2 = pnand %p339_p13, %p650_p9 }
  0xac   : > { %s254_s4 = scalar_lea.sflag [#allocation4], %s253_s17 }
  0xad   : > { %p371_p4 = pneg %p370_p2 }
  0xaf   : > { %549 = dma.done.wait (%p371_p4), %s254_s4, 64  }
  0xb0   : > { %551 = vsyncadd (%p371_p4), %s254_s4, 4294967232  ;;  %s19_s14 = sadd.s32 1, %s574_s14   ;;  %s756_s9 = smov %s558_s10 }
  0xb1   : > { %p16_p6 = scmp.ge.s32.totalorder %s19_s14, 4   ;;  %s757_s10 = smov %s562_s11 }
  0xb2   : > { %s758_s11 = smov %s688_s23  ;;  %s759_s12 = smov %s570_s13 }
  0xb3   : > { %s760_s13 = smov %s762_s30  ;;  %18 = sbr.rel (!%p16_p6) target bundleno = 7 (0x7), region = 78 }
  0xb8   :  { %260 = vsyncpa [#allocation3], 1 }
  0xb9   :  { %262 = vsyncpa [#allocation3 + $0x1], 1 }
  0xba   :  { %263 = vsyncpa [#allocation6], 1 }
  0xbb   :  { %265 = vsyncpa [#allocation6 + $0x1], 1 }
  0xbc   :  { %266 = vsyncpa [#allocation4], 1 }
  0xbd   :  { %268 = vsyncpa [#allocation4 + $0x1], 1 }

</bundles_post_ra>
